<compile_context>
chip_gen: v5e
topology: v5e:2x2
jax: 0.10.0
libtpu: 0.0.40
codegen_flags: <defaults>
</compile_context>

<pallas_src>
import functools
import numpy as np
import jax
import jax.numpy as jnp
from jax.experimental import pallas as pl
from jax.experimental.pallas import tpu as pltpu

# Small, module-consistent shapes.
B, T, C = 2, 4, 3          # batch, frames per clip, channels
H, W = 16, 16              # spatial
CT, HW = C * T, H * W
SIGMA = 7.0                # gaussian_filter(sigma=7)
TRUNCATE = 4.0             # scipy default truncate
BTILE = 8                  # batch rows per grid step (one full sublane tile)


def _gaussian_reflect_matrix(n, sigma, truncate):
    """Dense (n, n) matrix replicating scipy.ndimage 1-D gaussian filtering with
    mode='reflect'. The period-2n mod + mirror handles any kernel radius."""
    radius = int(truncate * sigma + 0.5)
    xs = np.arange(-radius, radius + 1, dtype=np.float64)
    w = np.exp(-0.5 * (xs / sigma) ** 2)
    w = w / w.sum()
    m = np.zeros((n, n), dtype=np.float32)
    for i in range(n):
        for k in range(-radius, radius + 1):
            j = (i + k) % (2 * n)          # reflect extension is 2n-periodic
            if j >= n:
                j = 2 * n - 1 - j          # mirror (edge pixel included)
            m[i, j] += w[k + radius]
    return m


def _gaussian_2d_operator(h, w, sigma, truncate):
    """(h*w, h*w) operator G such that, for a row-major flattened map q_flat,
    q_flat @ G == vec(gaussian_filter(q, sigma, mode='reflect'))."""
    gh = _gaussian_reflect_matrix(h, sigma, truncate)   # filter along axis 0
    gw = _gaussian_reflect_matrix(w, sigma, truncate)   # filter along axis 1
    return np.kron(gh.T, gw.T).astype(np.float32)


def tased_batch_kernel(x_ref, g_ref, o_ref, *, w_scaled, bias):
    # x_ref: (BTILE, T*C, H*W) f32   raw pixel values in [0, 255]
    # g_ref: (H*W, H*W)        bf16  fused 2-D gaussian (reflect) operator
    # o_ref: (BTILE, H*W)      f32   normalized saliency rows (pre-uint8 cast)

    # transform() folded into the constants:
    #   z = sum_i w_i * (2*x_i - 255)/255 = sum_i (2*w_i/255) * x_i - sum_i w_i
    z = jnp.full((BTILE, HW), bias, dtype=jnp.float32)
    for i in range(CT):                            # 12 constant-weighted slabs
        z = z + x_ref[:, i, :] * w_scaled[i]
    smap = jax.nn.sigmoid(z)                       # synthetic TASED-Net stand-in

    # (smap*255).astype(int32): trunc == floor because sigmoid >= 0. The /255 of
    # the requantization cancels exactly against the final *255 normalization.
    q = jnp.floor(smap * 255.0)                    # integers in [0,254] -> exact bf16

    # gaussian_filter(sigma=7): one lane-dense bf16 MXU matmul over flattened HW
    sg = jnp.dot(q.astype(jnp.bfloat16), g_ref[...],
                 preferred_element_type=jnp.float32)        # (BTILE, HW)

    # smap / max(smap) * 255 (per clip; exact divide so the max pixel is 255;
    # guarded against all-zero padded rows).
    m = jnp.maximum(jnp.max(sg, axis=1, keepdims=True), 1e-12)
    o_ref[...] = (sg / m) * 255.0


def tased_feature_extractor(x, g2d_bf16, w_scaled, bias):
    """x: (B, T, C, H, W) float32 in [0, 255]. Returns (B, H, W) uint8."""
    b = x.shape[0]
    # permute(0,2,1,3,4) removed: contiguous reshape only; the head weight vector
    # was reordered (t,c)-major host-side so the reduction is identical.
    xp = x.reshape(b, CT, HW)
    nb = pl.cdiv(b, BTILE)
    bp = nb * BTILE
    if bp != b:                                    # pad batch to full sublane tiles
        xp = jnp.pad(xp, ((0, bp - b), (0, 0), (0, 0)))

    cost = pl.CostEstimate(
        flops=2 * bp * HW * HW + 2 * bp * CT * HW,
        transcendentals=bp * HW,
        bytes_accessed=bp * CT * HW * 4 + HW * HW * 2 + bp * HW * 4,
    )

    out = pl.pallas_call(
        functools.partial(tased_batch_kernel, w_scaled=w_scaled, bias=bias),
        out_shape=jax.ShapeDtypeStruct((bp, HW), jnp.float32),
        grid=(nb,),
        in_specs=[
            pl.BlockSpec((BTILE, CT, HW), lambda i: (i, 0, 0)),
            pl.BlockSpec((HW, HW), lambda i: (0, 0)),     # same block -> stays resident
        ],
        out_specs=pl.BlockSpec((BTILE, HW), lambda i: (i, 0)),
        compiler_params=pltpu.CompilerParams(
            dimension_semantics=("parallel",)),           # v7x: shard batch over 2 TCs
        cost_estimate=cost,
    )(xp, g2d_bf16)

    # torch.from_numpy / torch.stack / .to('cuda') glue: final dtype is uint8.
    return out[:b].reshape(b, H, W).astype(jnp.uint8)


if __name__ == "__main__":
    key = jax.random.PRNGKey(0)
    x = jax.random.uniform(key, (B, T, C, H, W), jnp.float32, 0.0, 255.0)

    # Deterministic synthetic saliency-head weights (stand-in for TASED-Net),
    # defined over (c, t) and reordered (t, c)-major so no transpose is needed.
    wm = (np.arange(C * T, dtype=np.float64).reshape(C, T)
          - (C * T - 1) / 2.0) / float(C * T)             # (C, T)
    w_tc = wm.T.reshape(-1)                               # index = t*C + c
    w_scaled = tuple(float(v) * (2.0 / 255.0) for v in w_tc)  # transform() fold
    bias = float(-w_tc.sum())                                  # transform() fold

    g2d = jnp.asarray(_gaussian_2d_operator(H, W, SIGMA, TRUNCATE),
                      dtype=jnp.bfloat16)

    out = tased_feature_extractor(x, g2d, w_scaled, bias)
    out = jax.block_until_ready(out)
    assert out.shape == (B, H, W) and out.dtype == jnp.uint8
    print("KERNEL_OK")
</pallas_src>

<mosaic_0001>
module attributes {stable_mosaic.version = 11 : i64} {
  func.func @tased_batch_kernel(%arg0: i32, %arg1: memref<8x12x256xf32, #tpu.memory_space<vmem>>, %arg2: memref<256x256xbf16, #tpu.memory_space<vmem>>, %arg3: memref<8x256xf32, #tpu.memory_space<vmem>>) attributes {dimension_semantics = [#tpu.dimension_semantics<parallel>], iteration_bounds = array<i64: 1>, scalar_prefetch = 0 : i64, scratch_operands = 0 : i64, tpu.core_type = #tpu.core_type<tc>, window_params = [{transform_indices = @transform_0, window_bounds = array<i64: 8, 12, 256>}, {pipeline_mode = #tpu.pipeline_mode<synchronous>, transform_indices = @transform_1, window_bounds = array<i64: 256, 256>}, {transform_indices = @transform_2, window_bounds = array<i64: 8, 256>}]} {
    %cst = arith.constant -5.55111512E-17 : f32
    %0 = vector.broadcast %cst : f32 to vector<8x256xf32>
    %c0 = arith.constant 0 : index
    %c0_0 = arith.constant 0 : index
    %c0_1 = arith.constant 0 : index
    %1 = vector.load %arg1[%c0, %c0_0, %c0_1] : memref<8x12x256xf32, #tpu.memory_space<vmem>>, vector<8x1x256xf32>
    %2 = vector.shape_cast %1 : vector<8x1x256xf32> to vector<8x256xf32>
    %cst_2 = arith.constant -0.00359477126 : f32
    %3 = vector.broadcast %cst_2 : f32 to vector<8x256xf32>
    %4 = arith.mulf %2, %3 : vector<8x256xf32>
    %5 = arith.addf %0, %4 : vector<8x256xf32>
    %c0_3 = arith.constant 0 : index
    %c1 = arith.constant 1 : index
    %c0_4 = arith.constant 0 : index
    %6 = vector.load %arg1[%c0_3, %c1, %c0_4] : memref<8x12x256xf32, #tpu.memory_space<vmem>>, vector<8x1x256xf32>
    %7 = vector.shape_cast %6 : vector<8x1x256xf32> to vector<8x256xf32>
    %cst_5 = arith.constant -9.80392214E-4 : f32
    %8 = vector.broadcast %cst_5 : f32 to vector<8x256xf32>
    %9 = arith.mulf %7, %8 : vector<8x256xf32>
    %10 = arith.addf %5, %9 : vector<8x256xf32>
    %c0_6 = arith.constant 0 : index
    %c2 = arith.constant 2 : index
    %c0_7 = arith.constant 0 : index
    %11 = vector.load %arg1[%c0_6, %c2, %c0_7] : memref<8x12x256xf32, #tpu.memory_space<vmem>>, vector<8x1x256xf32>
    %12 = vector.shape_cast %11 : vector<8x1x256xf32> to vector<8x256xf32>
    %cst_8 = arith.constant 0.00163398695 : f32
    %13 = vector.broadcast %cst_8 : f32 to vector<8x256xf32>
    %14 = arith.mulf %12, %13 : vector<8x256xf32>
    %15 = arith.addf %10, %14 : vector<8x256xf32>
    %c0_9 = arith.constant 0 : index
    %c3 = arith.constant 3 : index
    %c0_10 = arith.constant 0 : index
    %16 = vector.load %arg1[%c0_9, %c3, %c0_10] : memref<8x12x256xf32, #tpu.memory_space<vmem>>, vector<8x1x256xf32>
    %17 = vector.shape_cast %16 : vector<8x1x256xf32> to vector<8x256xf32>
    %cst_11 = arith.constant -0.00294117653 : f32
    %18 = vector.broadcast %cst_11 : f32 to vector<8x256xf32>
    %19 = arith.mulf %17, %18 : vector<8x256xf32>
    %20 = arith.addf %15, %19 : vector<8x256xf32>
    %c0_12 = arith.constant 0 : index
    %c4 = arith.constant 4 : index
    %c0_13 = arith.constant 0 : index
    %21 = vector.load %arg1[%c0_12, %c4, %c0_13] : memref<8x12x256xf32, #tpu.memory_space<vmem>>, vector<8x1x256xf32>
    %22 = vector.shape_cast %21 : vector<8x1x256xf32> to vector<8x256xf32>
    %cst_14 = arith.constant -3.26797395E-4 : f32
    %23 = vector.broadcast %cst_14 : f32 to vector<8x256xf32>
    %24 = arith.mulf %22, %23 : vector<8x256xf32>
    %25 = arith.addf %20, %24 : vector<8x256xf32>
    %c0_15 = arith.constant 0 : index
    %c5 = arith.constant 5 : index
    %c0_16 = arith.constant 0 : index
    %26 = vector.load %arg1[%c0_15, %c5, %c0_16] : memref<8x12x256xf32, #tpu.memory_space<vmem>>, vector<8x1x256xf32>
    %27 = vector.shape_cast %26 : vector<8x1x256xf32> to vector<8x256xf32>
    %cst_17 = arith.constant 0.0022875818 : f32
    %28 = vector.broadcast %cst_17 : f32 to vector<8x256xf32>
    %29 = arith.mulf %27, %28 : vector<8x256xf32>
    %30 = arith.addf %25, %29 : vector<8x256xf32>
    %c0_18 = arith.constant 0 : index
    %c6 = arith.constant 6 : index
    %c0_19 = arith.constant 0 : index
    %31 = vector.load %arg1[%c0_18, %c6, %c0_19] : memref<8x12x256xf32, #tpu.memory_space<vmem>>, vector<8x1x256xf32>
    %32 = vector.shape_cast %31 : vector<8x1x256xf32> to vector<8x256xf32>
    %cst_20 = arith.constant -0.0022875818 : f32
    %33 = vector.broadcast %cst_20 : f32 to vector<8x256xf32>
    %34 = arith.mulf %32, %33 : vector<8x256xf32>
    %35 = arith.addf %30, %34 : vector<8x256xf32>
    %c0_21 = arith.constant 0 : index
    %c7 = arith.constant 7 : index
    %c0_22 = arith.constant 0 : index
    %36 = vector.load %arg1[%c0_21, %c7, %c0_22] : memref<8x12x256xf32, #tpu.memory_space<vmem>>, vector<8x1x256xf32>
    %37 = vector.shape_cast %36 : vector<8x1x256xf32> to vector<8x256xf32>
    %cst_23 = arith.constant 3.26797395E-4 : f32
    %38 = vector.broadcast %cst_23 : f32 to vector<8x256xf32>
    %39 = arith.mulf %37, %38 : vector<8x256xf32>
    %40 = arith.addf %35, %39 : vector<8x256xf32>
    %c0_24 = arith.constant 0 : index
    %c8 = arith.constant 8 : index
    %c0_25 = arith.constant 0 : index
    %41 = vector.load %arg1[%c0_24, %c8, %c0_25] : memref<8x12x256xf32, #tpu.memory_space<vmem>>, vector<8x1x256xf32>
    %42 = vector.shape_cast %41 : vector<8x1x256xf32> to vector<8x256xf32>
    %cst_26 = arith.constant 0.00294117653 : f32
    %43 = vector.broadcast %cst_26 : f32 to vector<8x256xf32>
    %44 = arith.mulf %42, %43 : vector<8x256xf32>
    %45 = arith.addf %40, %44 : vector<8x256xf32>
    %c0_27 = arith.constant 0 : index
    %c9 = arith.constant 9 : index
    %c0_28 = arith.constant 0 : index
    %46 = vector.load %arg1[%c0_27, %c9, %c0_28] : memref<8x12x256xf32, #tpu.memory_space<vmem>>, vector<8x1x256xf32>
    %47 = vector.shape_cast %46 : vector<8x1x256xf32> to vector<8x256xf32>
    %cst_29 = arith.constant -0.00163398695 : f32
    %48 = vector.broadcast %cst_29 : f32 to vector<8x256xf32>
    %49 = arith.mulf %47, %48 : vector<8x256xf32>
    %50 = arith.addf %45, %49 : vector<8x256xf32>
    %c0_30 = arith.constant 0 : index
    %c10 = arith.constant 10 : index
    %c0_31 = arith.constant 0 : index
    %51 = vector.load %arg1[%c0_30, %c10, %c0_31] : memref<8x12x256xf32, #tpu.memory_space<vmem>>, vector<8x1x256xf32>
    %52 = vector.shape_cast %51 : vector<8x1x256xf32> to vector<8x256xf32>
    %cst_32 = arith.constant 9.80392214E-4 : f32
    %53 = vector.broadcast %cst_32 : f32 to vector<8x256xf32>
    %54 = arith.mulf %52, %53 : vector<8x256xf32>
    %55 = arith.addf %50, %54 : vector<8x256xf32>
    %c0_33 = arith.constant 0 : index
    %c11 = arith.constant 11 : index
    %c0_34 = arith.constant 0 : index
    %56 = vector.load %arg1[%c0_33, %c11, %c0_34] : memref<8x12x256xf32, #tpu.memory_space<vmem>>, vector<8x1x256xf32>
    %57 = vector.shape_cast %56 : vector<8x1x256xf32> to vector<8x256xf32>
    %cst_35 = arith.constant 0.00359477126 : f32
    %58 = vector.broadcast %cst_35 : f32 to vector<8x256xf32>
    %59 = arith.mulf %57, %58 : vector<8x256xf32>
    %60 = arith.addf %55, %59 : vector<8x256xf32>
    %61 = arith.negf %60 : vector<8x256xf32>
    %62 = math.exp %61 : vector<8x256xf32>
    %cst_36 = arith.constant 1.000000e+00 : f32
    %63 = vector.broadcast %cst_36 : f32 to vector<8x256xf32>
    %64 = arith.addf %63, %62 : vector<8x256xf32>
    %65 = arith.divf %63, %64 : vector<8x256xf32>
    %cst_37 = arith.constant 2.550000e+02 : f32
    %66 = vector.broadcast %cst_37 : f32 to vector<8x256xf32>
    %67 = arith.mulf %65, %66 : vector<8x256xf32>
    %68 = math.floor %67 : vector<8x256xf32>
    %69 = arith.truncf %68 : vector<8x256xf32> to vector<8x256xbf16>
    %c0_38 = arith.constant 0 : index
    %c0_39 = arith.constant 0 : index
    %70 = vector.load %arg2[%c0_38, %c0_39] : memref<256x256xbf16, #tpu.memory_space<vmem>>, vector<256x256xbf16>
    %cst_40 = arith.constant dense<0.000000e+00> : vector<8x256xf32>
    %71 = tpu.matmul %69, %70, %cst_40 {dimension_numbers = #tpu.dot_dimension_numbers<[1], [0], [0], [1], [0, 0, 1, 1], [], []>} : vector<8x256xbf16>, vector<256x256xbf16>, vector<8x256xf32> -> vector<8x256xf32>
    %cst_41 = arith.constant dense<0xFF800000> : vector<8xf32>
    %72 = vector.multi_reduction <maximumf>, %71, %cst_41 [1] : vector<8x256xf32> to vector<8xf32>
    %73 = vector.shape_cast %72 : vector<8xf32> to vector<8x1xf32>
    %cst_42 = arith.constant 9.99999996E-13 : f32
    %74 = vector.broadcast %cst_42 : f32 to vector<8x1xf32>
    %75 = arith.maximumf %73, %74 : vector<8x1xf32>
    %76 = vector.broadcast %75 : vector<8x1xf32> to vector<8x256xf32>
    %77 = arith.divf %71, %76 : vector<8x256xf32>
    %cst_43 = arith.constant 2.550000e+02 : f32
    %78 = vector.broadcast %cst_43 : f32 to vector<8x256xf32>
    %79 = arith.mulf %77, %78 : vector<8x256xf32>
    %c0_44 = arith.constant 0 : index
    %c0_45 = arith.constant 0 : index
    %80 = vector.load %arg3[%c0_44, %c0_45] : memref<8x256xf32, #tpu.memory_space<vmem>>, vector<8x256xf32>
    tpu.vector_store %arg3[%c0_44, %c0_45], %79 {strides = array<i32>} : memref<8x256xf32, #tpu.memory_space<vmem>>, vector<8x256xf32>,
    return
  }
  func.func @transform_0(%arg0: i32) -> (i32, i32, i32) {
    %c0_i32 = arith.constant 0 : i32
    %c0_i32_0 = arith.constant 0 : i32
    %c0_i32_1 = arith.constant 0 : i32
    return %arg0, %c0_i32, %c0_i32_0 : i32, i32, i32
  }
  func.func @transform_1(%arg0: i32) -> (i32, i32) {
    %c0_i32 = arith.constant 0 : i32
    %c0_i32_0 = arith.constant 0 : i32
    %c0_i32_1 = arith.constant 0 : i32
    return %c0_i32, %c0_i32_0 : i32, i32
  }
  func.func @transform_2(%arg0: i32) -> (i32, i32) {
    %c0_i32 = arith.constant 0 : i32
    %c0_i32_0 = arith.constant 0 : i32
    return %arg0, %c0_i32 : i32, i32
  }
}

</mosaic_0001>

<bundles_post_ra>
// kernel: tpu_custom_call.1
= control target key start
LH: loop header
LB: loop body
LE: loop exit
PB: predicated region body
PF: predicated region fallthrough
CT: control target
= control target key end

     0   :  { %s2154_s0 = inlined_call_operand.vmem [shape: f32[8,12,256], index: 0, kind: input, shape index: {}]   ;;  %s2155_s1 = inlined_call_operand.vmem [shape: bf16[256,256], index: 1, kind: input, shape index: {}]   ;;  %s2156_s2 = inlined_call_operand.hbm [shape: f32[8,256], index: 2, kind: output, shape index: {}]  }
   0x1   :  { %v1135_v0 = vld [vmem:[%s2155_s1 + $0x70] sm:$0xf]  ;;  %v1220_v1 = vld [vmem:[%s2155_s1 + $0x74] sm:$0xf0]  ;;  %v1219_v5 = vld [vmem:[%s2155_s1 + $0x74] sm:$0xf] }
   0x2   :  { %v1199_v2 = vld [vmem:[%s2155_s1 + $0xf0] sm:$0xf]  ;;  %v1136_v3 = vor.u32 %v1220_v1, %v1135_v0  ;;  %v1236_v4 = vld [vmem:[%s2155_s1 + $0xf4] sm:$0xf0]  ;;  %v1137_v6 = vld [vmem:[%s2155_s1 + $0x78] sm:$0xf0] }
   0x3   :  { %v1200_v7 = vor.u32 %v1236_v4, %v1199_v2  ;;  %v1140_v8 = vor.u32 %v1219_v5, %v1137_v6  ;;  %v1235_v9 = vld [vmem:[%s2155_s1 + $0xf4] sm:$0xf]  ;;  %v1201_v10 = vld [vmem:[%s2155_s1 + $0xf8] sm:$0xf0]  ;;  %v1127_v11 = vld [vmem:[%s2155_s1 + $0x60] sm:$0xf] }
   0x4   :  { %882 = vmatpush.bf16.msra.mxu0 %v1136_v3  ;;  %v1204_v12 = vor.u32 %v1235_v9, %v1201_v10  ;;  %v1218_v13 = vld [vmem:[%s2155_s1 + $0x64] sm:$0xf0]  ;;  %v1191_v14 = vld [vmem:[%s2155_s1 + $0xe0] sm:$0xf]  ;;  %v1217_v18 = vld [vmem:[%s2155_s1 + $0x64] sm:$0xf] }
   0x5   :  { %v1234_v15 = vld [vmem:[%s2155_s1 + $0xe4] sm:$0xf0]  ;;  %895 = vmatpush.bf16.msra.mxu1 %v1200_v7  ;;  %908 = vmatpush.bf16.msra.mxu2 %v1140_v8  ;;  %v1128_v16 = vor.u32 %v1218_v13, %v1127_v11  ;;  %v1129_v19 = vld [vmem:[%s2155_s1 + $0x68] sm:$0xf0]  ;;  %v1233_v20 = vld [vmem:[%s2155_s1 + $0xe4] sm:$0xf] }
   0x6   :  { %v1192_v17 = vor.u32 %v1234_v15, %v1191_v14  ;;  %921 = vmatpush.bf16.msra.mxu3 %v1204_v12  ;;  %v1132_v21 = vor.u32 %v1217_v18, %v1129_v19  ;;  %v1193_v22 = vld [vmem:[%s2155_s1 + $0xe8] sm:$0xf0]  ;;  %v1119_v23 = vld [vmem:[%s2155_s1 + $0x50] sm:$0xf]  ;;  %v1216_v24 = vld [vmem:[%s2155_s1 + $0x54] sm:$0xf0] }
   0x7   :  { %v1196_v25 = vor.u32 %v1233_v20, %v1193_v22  ;;  %v1183_v26 = vld [vmem:[%s2155_s1 + $0xd0] sm:$0xf]  ;;  %v1232_v27 = vld [vmem:[%s2155_s1 + $0xd4] sm:$0xf0]  ;;  %v1215_v28 = vld [vmem:[%s2155_s1 + $0x54] sm:$0xf]  ;;  %v1120_v29 = vor.u32 %v1216_v24, %v1119_v23 }
   0x8   :  { %883 = vmatpush.bf16.msra.mxu0 %v1128_v16  ;;  %v1121_v30 = vld [vmem:[%s2155_s1 + $0x58] sm:$0xf0]  ;;  %v1231_v31 = vld [vmem:[%s2155_s1 + $0xd4] sm:$0xf]  ;;  %v1184_v33 = vor.u32 %v1232_v27, %v1183_v26  ;;  %v1111_v35 = vld [vmem:[%s2155_s1 + $0x40] sm:$0xf] }
   0x9   :  { %v1185_v32 = vld [vmem:[%s2155_s1 + $0xd8] sm:$0xf0]  ;;  %896 = vmatpush.bf16.msra.mxu1 %v1192_v17  ;;  %909 = vmatpush.bf16.msra.mxu2 %v1132_v21  ;;  %v1124_v34 = vor.u32 %v1215_v28, %v1121_v30  ;;  %v1214_v36 = vld [vmem:[%s2155_s1 + $0x44] sm:$0xf0]  ;;  %v1175_v37 = vld [vmem:[%s2155_s1 + $0xc0] sm:$0xf] }
   0xa   :  { %922 = vmatpush.bf16.msra.mxu3 %v1196_v25  ;;  %v1188_v38 = vor.u32 %v1231_v31, %v1185_v32  ;;  %v1230_v39 = vld [vmem:[%s2155_s1 + $0xc4] sm:$0xf0]  ;;  %v1213_v40 = vld [vmem:[%s2155_s1 + $0x44] sm:$0xf]  ;;  %v1113_v41 = vld [vmem:[%s2155_s1 + $0x48] sm:$0xf0]  ;;  %v1112_v44 = vor.u32 %v1214_v36, %v1111_v35 }
   0xb   :  { %v1229_v42 = vld [vmem:[%s2155_s1 + $0xc4] sm:$0xf]  ;;  %v1177_v43 = vld [vmem:[%s2155_s1 + $0xc8] sm:$0xf0]  ;;  %v1176_v45 = vor.u32 %v1230_v39, %v1175_v37  ;;  %v1116_v46 = vor.u32 %v1213_v40, %v1113_v41  ;;  %v1103_v47 = vld [vmem:[%s2155_s1 + $0x30] sm:$0xf] }
   0xc   :  { %884 = vmatpush.bf16.msra.mxu0 %v1120_v29  ;;  %v1212_v48 = vld [vmem:[%s2155_s1 + $0x34] sm:$0xf0]  ;;  %v1167_v49 = vld [vmem:[%s2155_s1 + $0xb0] sm:$0xf]  ;;  %v1180_v50 = vor.u32 %v1229_v42, %v1177_v43  ;;  %v1211_v52 = vld [vmem:[%s2155_s1 + $0x34] sm:$0xf] }
   0xd   :  { %897 = vmatpush.bf16.msra.mxu1 %v1184_v33  ;;  %910 = vmatpush.bf16.msra.mxu2 %v1124_v34  ;;  %v1228_v51 = vld [vmem:[%s2155_s1 + $0xb4] sm:$0xf0]  ;;  %v1105_v53 = vld [vmem:[%s2155_s1 + $0x38] sm:$0xf0]  ;;  %v1227_v54 = vld [vmem:[%s2155_s1 + $0xb4] sm:$0xf]  ;;  %v1104_v56 = vor.u32 %v1212_v48, %v1103_v47 }
   0xe   :  { %923 = vmatpush.bf16.msra.mxu3 %v1188_v38  ;;  %v1169_v55 = vld [vmem:[%s2155_s1 + $0xb8] sm:$0xf0]  ;;  %v1168_v57 = vor.u32 %v1228_v51, %v1167_v49  ;;  %v1108_v58 = vor.u32 %v1211_v52, %v1105_v53  ;;  %v1095_v59 = vld [vmem:[%s2155_s1 + $0x20] sm:$0xf]  ;;  %v1210_v60 = vld [vmem:[%s2155_s1 + $0x24] sm:$0xf0] }
   0xf   :  { %v1159_v61 = vld [vmem:[%s2155_s1 + $0xa0] sm:$0xf]  ;;  %v1172_v62 = vor.u32 %v1227_v54, %v1169_v55  ;;  %v1226_v63 = vld [vmem:[%s2155_s1 + $0xa4] sm:$0xf0]  ;;  %v1209_v0 = vld [vmem:[%s2155_s1 + $0x24] sm:$0xf]  ;;  %v1096_v4 = vor.u32 %v1210_v60, %v1095_v59 }
  0x10   :  { %885 = vmatpush.bf16.msra.mxu0 %v1112_v44  ;;  %v1097_v1 = vld [vmem:[%s2155_s1 + $0x28] sm:$0xf0]  ;;  %v1225_v2 = vld [vmem:[%s2155_s1 + $0xa4] sm:$0xf]  ;;  %v1087_v5 = vld [vmem:[%s2155_s1 + $0x10] sm:$0xf]  ;;  %v1160_v7 = vor.u32 %v1226_v63, %v1159_v61 }
  0x11   :  { %898 = vmatpush.bf16.msra.mxu1 %v1176_v45  ;;  %911 = vmatpush.bf16.msra.mxu2 %v1116_v46  ;;  %v1161_v3 = vld [vmem:[%s2155_s1 + $0xa8] sm:$0xf0]  ;;  %v1208_v6 = vld [vmem:[%s2155_s1 + $0x14] sm:$0xf0]  ;;  %v1100_v8 = vor.u32 %v1209_v0, %v1097_v1  ;;  %v1151_v9 = vld [vmem:[%s2155_s1 + $0x90] sm:$0xf] }
  0x12   :  { %924 = vmatpush.bf16.msra.mxu3 %v1180_v50  ;;  %v1224_v10 = vld [vmem:[%s2155_s1 + $0x94] sm:$0xf0]  ;;  %v1207_v11 = vld [vmem:[%s2155_s1 + $0x14] sm:$0xf]  ;;  %v1164_v12 = vor.u32 %v1225_v2, %v1161_v3  ;;  %v1089_v13 = vld [vmem:[%s2155_s1 + $0x18] sm:$0xf0]  ;;  %v1088_v20 = vor.u32 %v1208_v6, %v1087_v5 }
  0x13   :  { %v1223_v14 = vld [vmem:[%s2155_s1 + $0x94] sm:$0xf]  ;;  %v1153_v15 = vld [vmem:[%s2155_s1 + $0x98] sm:$0xf0]  ;;  %v1079_v16 = vld [vmem:[%s2155_s1] sm:$0xf]  ;;  %v1152_v25 = vor.u32 %v1224_v10, %v1151_v9  ;;  %v1092_v26 = vor.u32 %v1207_v11, %v1089_v13 }
  0x14   :  { %886 = vmatpush.bf16.msra.mxu0 %v1104_v56  ;;  %v1206_v17 = vld [vmem:[%s2155_s1 + $0x4] sm:$0xf0]  ;;  %v1143_v18 = vld [vmem:[%s2155_s1 + $0x80] sm:$0xf]  ;;  %v1205_v21 = vld [vmem:[%s2155_s1 + $0x4] sm:$0xf]  ;;  %v1156_v31 = vor.u32 %v1223_v14, %v1153_v15 }
  0x15   :  { %899 = vmatpush.bf16.msra.mxu1 %v1168_v57  ;;  %912 = vmatpush.bf16.msra.mxu2 %v1108_v58  ;;  %v1222_v19 = vld [vmem:[%s2155_s1 + $0x84] sm:$0xf0]  ;;  %v1081_v22 = vld [vmem:[%s2155_s1 + $0x8] sm:$0xf0]  ;;  %v1221_v27 = vld [vmem:[%s2155_s1 + $0x84] sm:$0xf]  ;;  %v1080_v36 = vor.u32 %v1206_v17, %v1079_v16 }
  0x16   :  { %925 = vmatpush.bf16.msra.mxu3 %v1172_v62  ;;  %v12_v23 = vld [vmem:[%s2154_s0] ss:$8 sm:$0x3]  ;;  %v1145_v28 = vld [vmem:[%s2155_s1 + $0x88] sm:$0xf0]  ;;  %v1144_v37 = vor.u32 %v1222_v19, %v1143_v18  ;;  %v1084_v40 = vor.u32 %v1205_v21, %v1081_v22 }
  0x17   :  { %v974_v24 = vld [vmem:[%s2154_s0 + $0x20] ss:$8 sm:$0x3]  ;;  %v27_v38 = vmul.f32 -0.0035947713, %v12_v23  ;;  %v1148_v44 = vor.u32 %v1221_v27, %v1145_v28 }
  0x18   :  { %887 = vmatpush.bf16.msra.mxu0 %v1096_v4  ;;  %v975_v29 = vld [vmem:[%s2154_s0 + $0x40] ss:$8 sm:$0x3]  ;;  %v28_v39 = vmul.f32 -0.0035947713, %v974_v24 }
  0x19   :  { %900 = vmatpush.bf16.msra.mxu1 %v1160_v7  ;;  %913 = vmatpush.bf16.msra.mxu2 %v1100_v8  ;;  %v976_v30 = vld [vmem:[%s2154_s0 + $0x60] ss:$8 sm:$0x3]  ;;  %v29_v41 = vmul.f32 -0.0035947713, %v975_v29 }
  0x1a   :  { %926 = vmatpush.bf16.msra.mxu3 %v1164_v12  ;;  %v977_v32 = vld [vmem:[%s2154_s0 + $0x80] ss:$8 sm:$0x3]  ;;  %v30_v42 = vmul.f32 -0.0035947713, %v976_v30 }
  0x1b   :  { %v978_v33 = vld [vmem:[%s2154_s0 + $0xa0] ss:$8 sm:$0x3]  ;;  %v31_v43 = vmul.f32 -0.0035947713, %v977_v32 }
  0x1c   :  { %v979_v34 = vld [vmem:[%s2154_s0 + $0xc0] ss:$8 sm:$0x3]  ;;  %888 = vmatpush.bf16.msra.mxu0 %v1088_v20  ;;  %v1530_v45 = vmul.f32 -0.0035947713, %v978_v33 }
  0x1d   :  { %v980_v35 = vld [vmem:[%s2154_s0 + $0xe0] ss:$8 sm:$0x3]  ;;  %901 = vmatpush.bf16.msra.mxu1 %v1152_v25  ;;  %914 = vmatpush.bf16.msra.mxu2 %v1092_v26  ;;  %v1532_v46 = vmul.f32 -0.0035947713, %v979_v34 }
  0x1e   :  { %927 = vmatpush.bf16.msra.mxu3 %v1156_v31 }
  0x1f   :  { %7 = vsyncpa [#allocation3], 0  ;;  %v1534_v47 = vmul.f32 -0.0035947713, %v980_v35  ;;  %v1574_v63 = vadd.f32 -5.551115e-17, %v27_v38  ;;  %v36_v8 = vadd.f32 -5.551115e-17, %v28_v39 }
  0x20   :  { %v981_v48 = vld [vmem:[%s2154_s0 + $0x1] ss:$8 sm:$0x3]  ;;  %889 = vmatpush.bf16.msra.mxu0 %v1080_v36  ;;  %v989_v1 = vld [vmem:[%s2154_s0 + $0x2] ss:$8 sm:$0x3] }
  0x21   :  { %v982_v49 = vld [vmem:[%s2154_s0 + $0x21] ss:$8 sm:$0x3]  ;;  %902 = vmatpush.bf16.msra.mxu1 %v1144_v37  ;;  %915 = vmatpush.bf16.msra.mxu2 %v1084_v40  ;;  %v1560_v56 = vmul.f32 -0.0009803922, %v981_v48  ;;  %v37_v17 = vadd.f32 -5.551115e-17, %v29_v41 }
  0x22   :  { %v983_v50 = vld [vmem:[%s2154_s0 + $0x41] ss:$8 sm:$0x3]  ;;  %928 = vmatpush.bf16.msra.mxu3 %v1148_v44  ;;  %v1562_v57 = vmul.f32 -0.0009803922, %v982_v49  ;;  %v38_v26 = vadd.f32 -5.551115e-17, %v30_v42 }
  0x23   :  { %v984_v51 = vld [vmem:[%s2154_s0 + $0x61] ss:$8 sm:$0x3]  ;;  %v1564_v58 = vmul.f32 -0.0009803922, %v983_v50  ;;  %v39_v35 = vadd.f32 -5.551115e-17, %v31_v43 }
  0x24   :  { %v985_v52 = vld [vmem:[%s2154_s0 + $0x81] ss:$8 sm:$0x3]  ;;  %v1566_v59 = vmul.f32 -0.0009803922, %v984_v51  ;;  %v40_v44 = vadd.f32 -5.551115e-17, %v1530_v45 }
  0x25   :  { %v986_v53 = vld [vmem:[%s2154_s0 + $0xa1] ss:$8 sm:$0x3]  ;;  %v1568_v60 = vmul.f32 -0.0009803922, %v985_v52  ;;  %v41_v45 = vadd.f32 -5.551115e-17, %v1532_v46 }
  0x26   :  { %v987_v54 = vld [vmem:[%s2154_s0 + $0xc1] ss:$8 sm:$0x3]  ;;  %v1570_v61 = vmul.f32 -0.0009803922, %v986_v53  ;;  %s965_s17 = sshll.u32 %s2156_s2, 4  ;;  %s966_s17 = int_to_ptr.hbm [resolvable:$true] %s965_s17 }
  0x27   :  { %v988_v55 = vld [vmem:[%s2154_s0 + $0xe1] ss:$8 sm:$0x3]  ;;  %v1572_v62 = vmul.f32 -0.0009803922, %v987_v54 }
  0x28   :  { %v1576_v0 = vmul.f32 -0.0009803922, %v988_v55  ;;  %v990_v2 = vld [vmem:[%s2154_s0 + $0x22] ss:$8 sm:$0x3] }
  0x29   :  { %v991_v3 = vld [vmem:[%s2154_s0 + $0x42] ss:$8 sm:$0x3]  ;;  %v1602_v10 = vmul.f32 0.001633987, %v989_v1 }
  0x2a   :  { %v992_v4 = vld [vmem:[%s2154_s0 + $0x62] ss:$8 sm:$0x3]  ;;  %v1604_v11 = vmul.f32 0.001633987, %v990_v2 }
  0x2b   :  { %v993_v5 = vld [vmem:[%s2154_s0 + $0x82] ss:$8 sm:$0x3]  ;;  %v1606_v12 = vmul.f32 0.001633987, %v991_v3 }
  0x2c   :  { %v994_v6 = vld [vmem:[%s2154_s0 + $0xa2] ss:$8 sm:$0x3]  ;;  %v1608_v13 = vmul.f32 0.001633987, %v992_v4 }
  0x2d   :  { %v995_v7 = vld [vmem:[%s2154_s0 + $0xc2] ss:$8 sm:$0x3]  ;;  %v1610_v14 = vmul.f32 0.001633987, %v993_v5 }
  0x2e   :  { %v996_v9 = vld [vmem:[%s2154_s0 + $0xe2] ss:$8 sm:$0x3]  ;;  %v1612_v15 = vmul.f32 0.001633987, %v994_v6 }
  0x2f   :  { %v1614_v16 = vmul.f32 0.001633987, %v995_v7  ;;  %v1616_v18 = vmul.f32 0.001633987, %v996_v9  ;;  %v42_v9 = vadd.f32 -5.551115e-17, %v1534_v47 }
  0x30   :  { %v997_v19 = vld [vmem:[%s2154_s0 + $0x3] ss:$8 sm:$0x3]  ;;  %v1005_v37 = vld [vmem:[%s2154_s0 + $0x4] ss:$8 sm:$0x3] }
  0x31   :  { %v998_v20 = vld [vmem:[%s2154_s0 + $0x23] ss:$8 sm:$0x3]  ;;  %v1642_v28 = vmul.f32 -0.0029411765, %v997_v19  ;;  %v67_v19 = vadd.f32 %v1560_v56, %v1574_v63  ;;  %v70_v63 = vadd.f32 %v1566_v59, %v38_v26 }
  0x32   :  { %v999_v21 = vld [vmem:[%s2154_s0 + $0x43] ss:$8 sm:$0x3]  ;;  %v1644_v29 = vmul.f32 -0.0029411765, %v998_v20 }
  0x33   :  { %v1000_v22 = vld [vmem:[%s2154_s0 + $0x63] ss:$8 sm:$0x3]  ;;  %v1646_v30 = vmul.f32 -0.0029411765, %v999_v21 }
  0x34   :  { %v1001_v23 = vld [vmem:[%s2154_s0 + $0x83] ss:$8 sm:$0x3]  ;;  %v1648_v31 = vmul.f32 -0.0029411765, %v1000_v22  ;;  %v68_v22 = vadd.f32 %v1562_v57, %v36_v8  ;;  %v72_v57 = vadd.f32 %v1570_v61, %v40_v44 }
  0x35   :  { %v1002_v24 = vld [vmem:[%s2154_s0 + $0xa3] ss:$8 sm:$0x3]  ;;  %v1650_v32 = vmul.f32 -0.0029411765, %v1001_v23 }
  0x36   :  { %v1003_v25 = vld [vmem:[%s2154_s0 + $0xc3] ss:$8 sm:$0x3]  ;;  %v1652_v33 = vmul.f32 -0.0029411765, %v1002_v24  ;;  %v104_v44 = vadd.f32 %v1612_v15, %v72_v57 }
  0x37   :  { %v1004_v27 = vld [vmem:[%s2154_s0 + $0xe3] ss:$8 sm:$0x3]  ;;  %v1654_v34 = vmul.f32 -0.0029411765, %v1003_v25 }
  0x38   :  { %v1656_v36 = vmul.f32 -0.0029411765, %v1004_v27  ;;  %v1006_v38 = vld [vmem:[%s2154_s0 + $0x24] ss:$8 sm:$0x3]  ;;  %v69_v27 = vadd.f32 %v1564_v58, %v37_v17  ;;  %v73_v58 = vadd.f32 %v1572_v62, %v41_v45  ;;  %v99_v62 = vadd.f32 %v1602_v10, %v67_v19 }
  0x39   :  { %v1007_v39 = vld [vmem:[%s2154_s0 + $0x44] ss:$8 sm:$0x3]  ;;  %v1683_v49 = vmul.f32 -0.0003267974, %v1005_v37 }
  0x3a   :  { %v1008_v40 = vld [vmem:[%s2154_s0 + $0x64] ss:$8 sm:$0x3]  ;;  %v1685_v50 = vmul.f32 -0.0003267974, %v1006_v38  ;;  %v71_v38 = vadd.f32 %v1568_v60, %v39_v35  ;;  %v74_v60 = vadd.f32 %v1576_v0, %v42_v9  ;;  %v100_v35 = vadd.f32 %v1604_v11, %v68_v22 }
  0x3b   :  { %v1009_v41 = vld [vmem:[%s2154_s0 + $0x84] ss:$8 sm:$0x3]  ;;  %v1687_v51 = vmul.f32 -0.0003267974, %v1007_v39  ;;  %v131_v15 = vadd.f32 %v1642_v28, %v99_v62 }
  0x3c   :  { %v1010_v42 = vld [vmem:[%s2154_s0 + $0xa4] ss:$8 sm:$0x3]  ;;  %v1689_v52 = vmul.f32 -0.0003267974, %v1008_v40  ;;  %v101_v40 = vadd.f32 %v1606_v12, %v69_v27  ;;  %v105_v12 = vadd.f32 %v1614_v16, %v73_v58 }
  0x3d   :  { %v1011_v43 = vld [vmem:[%s2154_s0 + $0xc4] ss:$8 sm:$0x3]  ;;  %v1691_v53 = vmul.f32 -0.0003267974, %v1009_v41  ;;  %v163_v27 = vadd.f32 %v1683_v49, %v131_v15 }
  0x3e   :  { %v1012_v48 = vld [vmem:[%s2154_s0 + $0xe4] ss:$8 sm:$0x3]  ;;  %v1693_v54 = vmul.f32 -0.0003267974, %v1010_v42  ;;  %v102_v42 = vadd.f32 %v1608_v13, %v70_v63  ;;  %v137_v19 = vadd.f32 %v1654_v34, %v105_v12 }
  0x3f   :  { %v1695_v55 = vmul.f32 -0.0003267974, %v1011_v43  ;;  %v1698_v1 = vmul.f32 -0.0003267974, %v1012_v48  ;;  %v103_v43 = vadd.f32 %v1610_v14, %v71_v38 }
  0x40   :  { %v1013_v2 = vld [vmem:[%s2154_s0 + $0x5] ss:$8 sm:$0x3]  ;;  %v1021_v39 = vld [vmem:[%s2154_s0 + $0x6] ss:$8 sm:$0x3] }
  0x41   :  { %v1014_v3 = vld [vmem:[%s2154_s0 + $0x25] ss:$8 sm:$0x3]  ;;  %v1727_v21 = vmul.f32 0.0022875818, %v1013_v2 }
  0x42   :  { %v1015_v4 = vld [vmem:[%s2154_s0 + $0x45] ss:$8 sm:$0x3]  ;;  %v1730_v23 = vmul.f32 0.0022875818, %v1014_v3  ;;  %v106_v3 = vadd.f32 %v1616_v18, %v74_v60  ;;  %v134_v18 = vadd.f32 %v1648_v31, %v102_v42  ;;  %v136_v31 = vadd.f32 %v1652_v33, %v104_v44 }
  0x43   :  { %v1016_v5 = vld [vmem:[%s2154_s0 + $0x65] ss:$8 sm:$0x3]  ;;  %v1732_v24 = vmul.f32 0.0022875818, %v1015_v4 }
  0x44   :  { %v1017_v46 = vld [vmem:[%s2154_s0 + $0x85] ss:$8 sm:$0x3]  ;;  %v1734_v25 = vmul.f32 0.0022875818, %v1016_v5  ;;  %v132_v5 = vadd.f32 %v1644_v29, %v100_v35  ;;  %v135_v29 = vadd.f32 %v1650_v32, %v103_v43  ;;  %v168_v49 = vadd.f32 %v1693_v54, %v136_v31 }
  0x45   :  { %v1018_v6 = vld [vmem:[%s2154_s0 + $0xa5] ss:$8 sm:$0x3]  ;;  %v1737_v47 = vmul.f32 0.0022875818, %v1017_v46  ;;  %v133_v46 = vadd.f32 %v1646_v30, %v101_v40 }
  0x46   :  { %v1019_v7 = vld [vmem:[%s2154_s0 + $0xc5] ss:$8 sm:$0x3]  ;;  %v1739_v37 = vmul.f32 0.0022875818, %v1018_v6  ;;  %v164_v63 = vadd.f32 %v1685_v50, %v132_v5  ;;  %v169_v50 = vadd.f32 %v1695_v55, %v137_v19 }
  0x47   :  { %v1020_v20 = vld [vmem:[%s2154_s0 + $0xe5] ss:$8 sm:$0x3]  ;;  %v1741_v56 = vmul.f32 0.0022875818, %v1019_v7  ;;  %v165_v38 = vadd.f32 %v1687_v51, %v133_v46 }
  0x48   :  { %v1746_v8 = vmul.f32 0.0022875818, %v1020_v20  ;;  %v1022_v17 = vld [vmem:[%s2154_s0 + $0x26] ss:$8 sm:$0x3]  ;;  %v138_v20 = vadd.f32 %v1656_v36, %v106_v3  ;;  %v166_v36 = vadd.f32 %v1689_v52, %v134_v18  ;;  %v195_v52 = vadd.f32 %v1727_v21, %v163_v27 }
  0x49   :  { %v1023_v59 = vld [vmem:[%s2154_s0 + $0x46] ss:$8 sm:$0x3]  ;;  %v219_v11 = vmul.f32 -0.0022875818, %v1021_v39  ;;  %v196_v54 = vadd.f32 %v1730_v23, %v164_v63  ;;  %v197_v21 = vadd.f32 %v1732_v24, %v165_v38  ;;  %v200_v42 = vadd.f32 %v1739_v37, %v168_v49 }
  0x4a   :  { %v1024_v61 = vld [vmem:[%s2154_s0 + $0x66] ss:$8 sm:$0x3]  ;;  %v220_v48 = vmul.f32 -0.0022875818, %v1022_v17  ;;  %v167_v17 = vadd.f32 %v1691_v53, %v135_v29  ;;  %v170_v51 = vadd.f32 %v1698_v1, %v138_v20  ;;  %v198_v40 = vadd.f32 %v1734_v25, %v166_v36 }
  0x4b   :  { %v1025_v26 = vld [vmem:[%s2154_s0 + $0x86] ss:$8 sm:$0x3]  ;;  %v1781_v45 = vmul.f32 -0.0022875818, %v1023_v59  ;;  %v201_v43 = vadd.f32 %v1741_v56, %v169_v50 }
  0x4c   :  { %v1026_v41 = vld [vmem:[%s2154_s0 + $0xa6] ss:$8 sm:$0x3]  ;;  %v1783_v2 = vmul.f32 -0.0022875818, %v1024_v61  ;;  %v202_v44 = vadd.f32 %v1746_v8, %v170_v51  ;;  %v228_v15 = vadd.f32 %v220_v48, %v196_v54 }
  0x4d   :  { %v1027_v0 = vld [vmem:[%s2154_s0 + $0xc6] ss:$8 sm:$0x3]  ;;  %v1786_v4 = vmul.f32 -0.0022875818, %v1025_v26  ;;  %v229_v18 = vadd.f32 %v1781_v45, %v197_v21 }
  0x4e   :  { %v1028_v10 = vld [vmem:[%s2154_s0 + $0xe6] ss:$8 sm:$0x3]  ;;  %v1788_v13 = vmul.f32 -0.0022875818, %v1026_v41  ;;  %v199_v41 = vadd.f32 %v1737_v47, %v167_v17  ;;  %v227_v47 = vadd.f32 %v219_v11, %v195_v52  ;;  %v230_v37 = vadd.f32 %v1783_v2, %v198_v40 }
  0x4f   :  { %v1790_v14 = vmul.f32 -0.0022875818, %v1027_v0  ;;  %v1795_v16 = vmul.f32 -0.0022875818, %v1028_v10 }
  0x50   :  { %v1029_v6 = vld [vmem:[%s2154_s0 + $0x7] ss:$8 sm:$0x3]  ;;  %v1037_v62 = vld [vmem:[%s2154_s0 + $0x10] ss:$8 sm:$0x3]  ;;  %v231_v56 = vadd.f32 %v1786_v4, %v199_v41  ;;  %v232_v11 = vadd.f32 %v1788_v13, %v200_v42 }
  0x51   :  { %v1030_v7 = vld [vmem:[%s2154_s0 + $0x27] ss:$8 sm:$0x3]  ;;  %v251_v34 = vmul.f32 0.0003267974, %v1029_v6  ;;  %v233_v45 = vadd.f32 %v1790_v14, %v201_v43  ;;  %v234_v13 = vadd.f32 %v1795_v16, %v202_v44 }
  0x52   :  { %v1031_v28 = vld [vmem:[%s2154_s0 + $0x47] ss:$8 sm:$0x3]  ;;  %v252_v57 = vmul.f32 0.0003267974, %v1030_v7 }
  0x53   :  { %v1032_v30 = vld [vmem:[%s2154_s0 + $0x67] ss:$8 sm:$0x3]  ;;  %v253_v39 = vmul.f32 0.0003267974, %v1031_v28  ;;  %v259_v29 = vadd.f32 %v251_v34, %v227_v47 }
  0x54   :  { %v1033_v9 = vld [vmem:[%s2154_s0 + $0x87] ss:$8 sm:$0x3]  ;;  %v254_v58 = vmul.f32 0.0003267974, %v1032_v30  ;;  %v260_v30 = vadd.f32 %v252_v57, %v228_v15 }
  0x55   :  { %v1034_v22 = vld [vmem:[%s2154_s0 + $0xa7] ss:$8 sm:$0x3]  ;;  %v255_v59 = vmul.f32 0.0003267974, %v1033_v9  ;;  %v261_v31 = vadd.f32 %v253_v39, %v229_v18 }
  0x56   :  { %v1035_v32 = vld [vmem:[%s2154_s0 + $0xc7] ss:$8 sm:$0x3]  ;;  %v256_v60 = vmul.f32 0.0003267974, %v1034_v22  ;;  %v262_v19 = vadd.f32 %v254_v58, %v230_v37 }
  0x57   :  { %v1036_v33 = vld [vmem:[%s2154_s0 + $0xe7] ss:$8 sm:$0x3]  ;;  %v257_v61 = vmul.f32 0.0003267974, %v1035_v32  ;;  %v263_v20 = vadd.f32 %v255_v59, %v231_v56 }
  0x58   :  { %v258_v26 = vmul.f32 0.0003267974, %v1036_v33  ;;  %v1038_v53 = vld [vmem:[%s2154_s0 + $0x30] ss:$8 sm:$0x3]  ;;  %v264_v27 = vadd.f32 %v256_v60, %v232_v11 }
  0x59   :  { %v1039_v35 = vld [vmem:[%s2154_s0 + $0x50] ss:$8 sm:$0x3]  ;;  %v283_v25 = vmul.f32 0.0029411765, %v1037_v62  ;;  %v265_v33 = vadd.f32 %v257_v61, %v233_v45 }
  0x5a   :  { %v1040_v55 = vld [vmem:[%s2154_s0 + $0x70] ss:$8 sm:$0x3]  ;;  %v284_v10 = vmul.f32 0.0029411765, %v1038_v53  ;;  %v266_v17 = vadd.f32 %v258_v26, %v234_v13 }
  0x5b   :  { %v1041_v1 = vld [vmem:[%s2154_s0 + $0x90] ss:$8 sm:$0x3]  ;;  %v285_v12 = vmul.f32 0.0029411765, %v1039_v35  ;;  %v291_v49 = vadd.f32 %v283_v25, %v259_v29 }
  0x5c   :  { %v1042_v0 = vld [vmem:[%s2154_s0 + $0xb0] ss:$8 sm:$0x3]  ;;  %v286_v3 = vmul.f32 0.0029411765, %v1040_v55  ;;  %v292_v50 = vadd.f32 %v284_v10, %v260_v30 }
  0x5d   :  { %v1043_v23 = vld [vmem:[%s2154_s0 + $0xd0] ss:$8 sm:$0x3]  ;;  %v287_v5 = vmul.f32 0.0029411765, %v1041_v1  ;;  %v293_v58 = vadd.f32 %v285_v12, %v261_v31 }
  0x5e   :  { %v1044_v24 = vld [vmem:[%s2154_s0 + $0xf0] ss:$8 sm:$0x3]  ;;  %v288_v46 = vmul.f32 0.0029411765, %v1042_v0  ;;  %v294_v61 = vadd.f32 %v286_v3, %v262_v19 }
  0x5f   :  { %v289_v6 = vmul.f32 0.0029411765, %v1043_v23  ;;  %v290_v8 = vmul.f32 0.0029411765, %v1044_v24  ;;  %v295_v52 = vadd.f32 %v287_v5, %v263_v20 }
  0x60   :  { %v1045_v7 = vld [vmem:[%s2154_s0 + $0x11] ss:$8 sm:$0x3]  ;;  %v1053_v39 = vld [vmem:[%s2154_s0 + $0x12] ss:$8 sm:$0x3]  ;;  %v296_v53 = vadd.f32 %v288_v46, %v264_v27 }
  0x61   :  { %v1046_v48 = vld [vmem:[%s2154_s0 + $0x31] ss:$8 sm:$0x3]  ;;  %v315_v32 = vmul.f32 -0.001633987, %v1045_v7  ;;  %v297_v35 = vadd.f32 %v289_v6, %v265_v33  ;;  %v298_v1 = vadd.f32 %v290_v8, %v266_v17 }
  0x62   :  { %v1047_v28 = vld [vmem:[%s2154_s0 + $0x51] ss:$8 sm:$0x3]  ;;  %v316_v16 = vmul.f32 -0.001633987, %v1046_v48 }
  0x63   :  { %v1048_v2 = vld [vmem:[%s2154_s0 + $0x71] ss:$8 sm:$0x3]  ;;  %v317_v63 = vmul.f32 -0.001633987, %v1047_v28  ;;  %v323_v21 = vadd.f32 %v315_v32, %v291_v49 }
  0x64   :  { %v1049_v4 = vld [vmem:[%s2154_s0 + $0x91] ss:$8 sm:$0x3]  ;;  %v318_v38 = vmul.f32 -0.001633987, %v1048_v2  ;;  %v324_v40 = vadd.f32 %v316_v16, %v292_v50 }
  0x65   :  { %v1050_v9 = vld [vmem:[%s2154_s0 + $0xb1] ss:$8 sm:$0x3]  ;;  %v319_v34 = vmul.f32 -0.001633987, %v1049_v4  ;;  %v325_v23 = vadd.f32 %v317_v63, %v293_v58 }
  0x66   :  { %v1051_v14 = vld [vmem:[%s2154_s0 + $0xd1] ss:$8 sm:$0x3]  ;;  %v320_v36 = vmul.f32 -0.001633987, %v1050_v9  ;;  %v326_v24 = vadd.f32 %v318_v38, %v294_v61 }
  0x67   :  { %v1052_v22 = vld [vmem:[%s2154_s0 + $0xf1] ss:$8 sm:$0x3]  ;;  %v321_v57 = vmul.f32 -0.001633987, %v1051_v14  ;;  %v327_v12 = vadd.f32 %v319_v34, %v295_v52 }
  0x68   :  { %v322_v51 = vmul.f32 -0.001633987, %v1052_v22  ;;  %v1054_v59 = vld [vmem:[%s2154_s0 + $0x32] ss:$8 sm:$0x3]  ;;  %v328_v3 = vadd.f32 %v320_v36, %v296_v53 }
  0x69   :  { %v1055_v60 = vld [vmem:[%s2154_s0 + $0x52] ss:$8 sm:$0x3]  ;;  %v347_v0 = vmul.f32 0.0009803922, %v1053_v39  ;;  %v329_v15 = vadd.f32 %v321_v57, %v297_v35 }
  0x6a   :  { %v1056_v26 = vld [vmem:[%s2154_s0 + $0x72] ss:$8 sm:$0x3]  ;;  %v348_v42 = vmul.f32 0.0009803922, %v1054_v59  ;;  %v330_v6 = vadd.f32 %v322_v51, %v298_v1 }
  0x6b   :  { %v1057_v62 = vld [vmem:[%s2154_s0 + $0x92] ss:$8 sm:$0x3]  ;;  %v349_v43 = vmul.f32 0.0009803922, %v1055_v60  ;;  %v355_v56 = vadd.f32 %v347_v0, %v323_v21 }
  0x6c   :  { %v1058_v54 = vld [vmem:[%s2154_s0 + $0xb2] ss:$8 sm:$0x3]  ;;  %v350_v44 = vmul.f32 0.0009803922, %v1056_v26  ;;  %v356_v11 = vadd.f32 %v348_v42, %v324_v40 }
  0x6d   :  { %v1059_v55 = vld [vmem:[%s2154_s0 + $0xd2] ss:$8 sm:$0x3]  ;;  %v351_v25 = vmul.f32 0.0009803922, %v1057_v62  ;;  %v357_v48 = vadd.f32 %v349_v43, %v325_v23 }
  0x6e   :  { %v1060_v41 = vld [vmem:[%s2154_s0 + $0xf2] ss:$8 sm:$0x3]  ;;  %v352_v47 = vmul.f32 0.0009803922, %v1058_v54  ;;  %v358_v28 = vadd.f32 %v350_v44, %v326_v24 }
  0x6f   :  { %v353_v10 = vmul.f32 0.0009803922, %v1059_v55  ;;  %v354_v5 = vmul.f32 0.0009803922, %v1060_v41  ;;  %v359_v4 = vadd.f32 %v351_v25, %v327_v12 }
  0x70   :  { %v1061_v46 = vld [vmem:[%s2154_s0 + $0x13] ss:$8 sm:$0x3]  ;;  %v360_v13 = vadd.f32 %v352_v47, %v328_v3 }
  0x71   :  { %v1062_v18 = vld [vmem:[%s2154_s0 + $0x33] ss:$8 sm:$0x3]  ;;  %v361_v29 = vadd.f32 %v353_v10, %v329_v15  ;;  %v379_v9 = vmul.f32 0.0035947713, %v1061_v46  ;;  %v362_v14 = vadd.f32 %v354_v5, %v330_v6 }
  0x72   :  { %v1063_v37 = vld [vmem:[%s2154_s0 + $0x53] ss:$8 sm:$0x3]  ;;  %v380_v31 = vmul.f32 0.0035947713, %v1062_v18 }
  0x73   :  { %v1064_v8 = vld [vmem:[%s2154_s0 + $0x73] ss:$8 sm:$0x3]  ;;  %v381_v19 = vmul.f32 0.0035947713, %v1063_v37  ;;  %v387_v16 = vadd.f32 %v379_v9, %v355_v56 }
  0x74   :  { %v1065_v7 = vld [vmem:[%s2154_s0 + $0x93] ss:$8 sm:$0x3]  ;;  %v382_v20 = vmul.f32 0.0035947713, %v1064_v8  ;;  %v388_v38 = vadd.f32 %v380_v31, %v356_v11 }
  0x75   :  { %v1066_v45 = vld [vmem:[%s2154_s0 + $0xb3] ss:$8 sm:$0x3]  ;;  %v383_v22 = vmul.f32 0.0035947713, %v1065_v7  ;;  %v389_v33 = vadd.f32 %v381_v19, %v357_v48 }
  0x76   :  { %v1067_v2 = vld [vmem:[%s2154_s0 + $0xd3] ss:$8 sm:$0x3]  ;;  %v384_v32 = vmul.f32 0.0035947713, %v1066_v45  ;;  %v390_v34 = vadd.f32 %v382_v20, %v358_v28 }
  0x77   :  { %v1068_v30 = vld [vmem:[%s2154_s0 + $0xf3] ss:$8 sm:$0x3]  ;;  %v385_v27 = vmul.f32 0.0035947713, %v1067_v2  ;;  %v391_v36 = vadd.f32 %v383_v22, %v359_v4  ;;  %s1298_s0 = smov [#allocation2]  }
  0x78   :  { %v386_v63 = vmul.f32 0.0035947713, %v1068_v30  ;;  %v392_v57 = vadd.f32 %v384_v32, %v360_v13  ;;  %v1069_v49 = vmul.f32 -1.442695, %v387_v16  ;;  %v1070_v51 = vmul.f32 -1.442695, %v388_v38 }
  0x79   :  { %v393_v17 = vadd.f32 %v385_v27, %v361_v29  ;;  %v1071_v39 = vmul.f32 -1.442695, %v389_v33  ;;  %v1072_v58 = vmul.f32 -1.442695, %v390_v34  ;;  %v1073_v59 = vmul.f32 -1.442695, %v391_v36 }
  0x7a   :  { %v394_v50 = vadd.f32 %v386_v63, %v362_v14  ;;  %1238 = vpow2.f32 %v1069_v49  ;;  %v1074_v60 = vmul.f32 -1.442695, %v392_v57  ;;  %s963_s14 = sshll.u32 %s1298_s0, 4  ;;  %s964_s14 = int_to_ptr.vmem [resolvable:$true] %s963_s14 }
  0x7b   :  { %1240 = vpow2.f32 %v1070_v51  ;;  %v1075_v61 = vmul.f32 -1.442695, %v393_v17 }
  0x7c   :  { %1242 = vpow2.f32 %v1071_v39  ;;  %v1076_v26 = vmul.f32 -1.442695, %v394_v50 }
  0x7d   :  { %1244 = vpow2.f32 %v1072_v58 }
  0x7e   :  { %1246 = vpow2.f32 %v1073_v59 }
  0x7f   :  { %1248 = vpow2.f32 %v1074_v60 }
  0x80   :  { %v1239_v62 = vpop.eup %1238  ;;  %1250 = vpow2.f32 %v1075_v61 }
  0x81   :  { %v1241_v52 = vpop.eup %1240  ;;  %1252 = vpow2.f32 %v1076_v26  ;;  %v419_v53 = vadd.f32 1.0, %v1239_v62 }
  0x82   :  { %v1243_v35 = vpop.eup %1242  ;;  %v1944_v54 = vadd.f32 1.0, %v1241_v52 }
  0x83   :  { %v1245_v55 = vpop.eup %1244  ;;  %v1946_v1 = vadd.f32 1.0, %v1243_v35  ;;  %1254 = vrcp.f32 %v419_v53  ;;  %v438_v41 = vand.u32 2147483648, %v419_v53  ;;  %v436_v42 = vand.u32 2147483647, %v419_v53 }
  0x84   :  { %v1247_v21 = vpop.eup %1246  ;;  %v1948_v40 = vadd.f32 1.0, %v1245_v55  ;;  %1256 = vrcp.f32 %v1944_v54  ;;  %v451_v43 = vand.u32 2147483647, %v1944_v54  ;;  %v453_v44 = vand.u32 2147483648, %v1944_v54 }
  0x85   :  { %v1249_v0 = vpop.eup %1248  ;;  %v1951_v23 = vadd.f32 1.0, %v1247_v21  ;;  %vm432_vm0 = vweird.f32 %v419_v53  ;;  %1258 = vrcp.f32 %v1946_v1  ;;  %v1958_v10 = vor.u32 1.1754944e-38, %v438_v41 }
  0x86   :  { %v1251_v24 = vpop.eup %1250  ;;  %v1956_v47 = vadd.f32 1.0, %v1249_v0  ;;  %vm447_vm1 = vweird.f32 %v1944_v54  ;;  %vm462_vm2 = vweird.f32 %v1946_v1  ;;  %v466_v3 = vand.u32 2147483647, %v1946_v1 }
  0x87   :  { %v1253_v25 = vpop.eup %1252  ;;  %v1962_v12 = vadd.f32 1.0, %v1251_v24  ;;  %v468_v15 = vand.u32 2147483648, %v1946_v1  ;;  %1260 = vrcp.f32 %v1948_v40  ;;  %vm1967_vm3 = vcmp.eq.f32.partialorder %v436_v42, 8.507059e+37 }
  0x88   :  { %vm1971_vm4 = vcmp.eq.f32.partialorder %v451_v43, 8.507059e+37  ;;  %v454_v18 = vor.u32 1.1754944e-38, %v453_v44  ;;  %v481_v37 = vand.u32 2147483647, %v1948_v40  ;;  %v483_v56 = vand.u32 2147483648, %v1948_v40 }
  0x89   :  { %v1255_v5 = vpop.eup %1254  ;;  %1262 = vrcp.f32 %v1951_v23  ;;  %v1978_v7 = vadd.f32 1.0, %v1253_v25  ;;  %vm477_vm6 = vweird.f32 %v1948_v40  ;;  %v469_v28 = vor.u32 1.1754944e-38, %v468_v15 }
  0x8a   :  { %v1257_v8 = vpop.eup %1256  ;;  %v428_v11 = vmul.f32 %v1255_v5, %v419_v53  ;;  %vm433_vm5 = vweird.f32 %v1255_v5  ;;  %vm492_vm8 = vweird.f32 %v1951_v23  ;;  %vm1983_vm9 = vcmp.eq.f32.partialorder %v466_v3, 8.507059e+37 }
  0x8b   :  { %v443_v48 = vmul.f32 %v1257_v8, %v1944_v54  ;;  %vm448_vm7 = vweird.f32 %v1257_v8  ;;  %v1259_v45 = vpop.eup %1258  ;;  %v496_v13 = vand.u32 2147483647, %v1951_v23  ;;  %v498_v29 = vand.u32 2147483648, %v1951_v23  ;;  %vm1999_vm13 = vmor %vm432_vm0, %vm433_vm5 }
  0x8c   :  { %v429_v2 = vsub.f32 1.0, %v428_v11  ;;  %1264 = vrcp.f32 %v1956_v47  ;;  %v458_v9 = vmul.f32 %v1259_v45, %v1946_v1  ;;  %vm1991_vm10 = vcmp.eq.f32.partialorder %v481_v37, 8.507059e+37  ;;  %vm2011_vm15 = vmor %vm447_vm1, %vm448_vm7 }
  0x8d   :  { %v444_v30 = vsub.f32 1.0, %v443_v48  ;;  %v484_v31 = vor.u32 1.1754944e-38, %v483_v56  ;;  %v1261_v19 = vpop.eup %1260  ;;  %vm463_vm11 = vweird.f32 %v1259_v45  ;;  %v511_v22 = vand.u32 2147483647, %v1956_v47 }
  0x8e   :  { %v430_v20 = vmul.f32 %v1255_v5, %v429_v2  ;;  %v459_v63 = vsub.f32 1.0, %v458_v9  ;;  %v473_v38 = vmul.f32 %v1261_v19, %v1948_v40  ;;  %vm2004_vm14 = vcmp.eq.f32.partialorder %v496_v13, 8.507059e+37  ;;  %vm2021_vm12 = vmor %vm462_vm2, %vm463_vm11 }
  0x8f   :  { %v1263_v32 = vpop.eup %1262  ;;  %v445_v16 = vmul.f32 %v1257_v8, %v444_v30  ;;  %vm478_vm0 = vweird.f32 %v1261_v19  ;;  %v499_v17 = vor.u32 1.1754944e-38, %v498_v29  ;;  %vm2025_vm1 = vcmp.eq.f32.partialorder %v511_v22, 8.507059e+37 }
  0x90   :  { %v431_v34 = vadd.f32 %v1255_v5, %v430_v20  ;;  %v488_v57 = vmul.f32 %v1263_v32, %v1951_v23  ;;  %v460_v50 = vmul.f32 %v1259_v45, %v459_v63  ;;  %v474_v51 = vsub.f32 1.0, %v473_v38  ;;  %vm2042_vm2 = vmor %vm477_vm6, %vm478_vm0 }
  0x91   :  { %v446_v49 = vadd.f32 %v1257_v8, %v445_v16  ;;  %vm493_vm5 = vweird.f32 %v1263_v32  ;;  %v513_v26 = vand.u32 2147483648, %v1956_v47  ;;  %1266 = vrcp.f32 %v1962_v12 }
  0x92   :  { %v1265_v39 = vpop.eup %1264  ;;  %v435_v58 = vsel %vm1999_vm13, %v1255_v5, %v431_v34  ;;  %v489_v60 = vsub.f32 1.0, %v488_v57  ;;  %v461_v52 = vadd.f32 %v1259_v45, %v460_v50  ;;  %v475_v53 = vmul.f32 %v1261_v19, %v474_v51 }
  0x93   :  { %v450_v62 = vsel %vm2011_vm15, %v1257_v8, %v446_v49  ;;  %vm522_vm7 = vweird.f32 %v1962_v12  ;;  %v440_v35 = vsel %vm1967_vm3, %v1958_v10, %v435_v58  ;;  %v503_v21 = vmul.f32 %v1265_v39, %v1956_v47  ;;  %vm2052_vm3 = vmor %vm492_vm8, %vm493_vm5 }
  0x94   :  { %v455_v54 = vsel %vm1971_vm4, %v454_v18, %v450_v62  ;;  %v490_v1 = vmul.f32 %v1263_v32, %v489_v60  ;;  %v465_v41 = vsel %vm2021_vm12, %v1259_v45, %v461_v52  ;;  %v476_v0 = vadd.f32 %v1261_v19, %v475_v53 }
  0x95   :  { %vm508_vm4 = vweird.f32 %v1265_v39  ;;  %v526_v40 = vand.u32 2147483647, %v1962_v12  ;;  %v504_v44 = vsub.f32 1.0, %v503_v21  ;;  %v514_v24 = vor.u32 1.1754944e-38, %v513_v26 }
  0x96   :  { %v491_v43 = vadd.f32 %v1263_v32, %v490_v1  ;;  %v528_v25 = vand.u32 2147483648, %v1962_v12  ;;  %v470_v10 = vsel %vm1983_vm9, %v469_v28, %v465_v41  ;;  %v480_v3 = vsel %vm2042_vm2, %v1261_v19, %v476_v0 }
  0x97   :  { %vm2062_vm6 = vcmp.eq.f32.partialorder %v526_v40, 8.507059e+37  ;;  %1268 = vrcp.f32 %v1978_v7  ;;  %v1267_v15 = vpop.eup %1266  ;;  %v485_v5 = vsel %vm1991_vm10, %v484_v31, %v480_v3  ;;  %v505_v6 = vmul.f32 %v1265_v39, %v504_v44 }
  0x98   :  { %v495_v46 = vsel %vm2052_vm3, %v1263_v32, %v491_v43  ;;  %vm537_vm8 = vweird.f32 %v1978_v7  ;;  %vm2181_vm9 = vweird.f32 %v1956_v47  ;;  %v518_v56 = vmul.f32 %v1267_v15, %v1962_v12 }
  0x99   :  { %v500_v18 = vsel %vm2004_vm14, %v499_v17, %v495_v46  ;;  %vm2077_vm11 = vmor %vm2181_vm9, %vm508_vm4  ;;  %v529_v8 = vor.u32 1.1754944e-38, %v528_v25  ;;  %v541_v11 = vand.u32 2147483647, %v1978_v7  ;;  %v506_v48 = vadd.f32 %v1265_v39, %v505_v6 }
  0x9a   :  { %v543_v28 = vand.u32 2147483648, %v1978_v7  ;;  %v2084_v45 = vmul.f32 255.0, %v440_v35  ;;  %v2086_v2 = vmul.f32 255.0, %v455_v54  ;;  %v519_v4 = vsub.f32 1.0, %v518_v56 }
  0x9b   :  { %vm523_vm10 = vweird.f32 %v1267_v15  ;;  %v2088_v13 = vmul.f32 255.0, %v470_v10  ;;  %v2090_v47 = vmul.f32 255.0, %v485_v5  ;;  %v510_v29 = vsel %vm2077_vm11, %v1265_v39, %v506_v48 }
  0x9c   :  { %vm2094_vm12 = vcmp.eq.f32.partialorder %v541_v11, 8.507059e+37  ;;  %v544_v9 = vor.u32 1.1754944e-38, %v543_v28  ;;  %v2098_v14 = vmul.f32 255.0, %v500_v18  ;;  %v555_v31 = vfloor.f32 %v2084_v45  ;;  %vm2107_vm13 = vmor %vm522_vm7, %vm523_vm10 }
  0x9d   :  { %v1269_v19 = vpop.eup %1268  ;;  %v515_v20 = vsel %vm2025_vm1, %v514_v24, %v510_v29  ;;  %v520_v22 = vmul.f32 %v1267_v15, %v519_v4  ;;  %v556_v32 = vfloor.f32 %v2086_v2  ;;  %v557_v27 = vfloor.f32 %v2088_v13 }
  0x9e   :  { %v533_v63 = vmul.f32 %v1269_v19, %v1978_v7  ;;  %vm538_vm14 = vweird.f32 %v1269_v19  ;;  %v552_v38 = vmul.f32 255.0, %v515_v20  ;;  %v558_v33 = vfloor.f32 %v2090_v47 }
  0x9f   :  { %v521_v34 = vadd.f32 %v1267_v15, %v520_v22  ;;  %v559_v36 = vfloor.f32 %v2098_v14  ;;  %v571_v57 = vperm.slane %v555_v31, 0  ;;  %v573_v17 = vperm.slane %v556_v32, 0  ;;  %vm2125_vm15 = vmor %vm537_vm8, %vm538_vm14 }
  0xa0   :  { %v534_v12 = vsub.f32 1.0, %v533_v63  ;;  %v560_v49 = vfloor.f32 %v552_v38  ;;  %v575_v50 = vperm.slane %v557_v27, 0  ;;  %v577_v51 = vperm.slane %v558_v33, 0 }
  0xa1   :  { %v525_v39 = vsel %vm2107_vm13, %v1267_v15, %v521_v34  ;;  %v579_v58 = vperm.slane %v559_v36, 0  ;;  %v603_v59 = vpack.c.bf16 %v571_v57, %v571_v57  ;;  %v605_v60 = vpack.c.bf16 %v573_v17, %v573_v17 }
  0xa2   :  { %v530_v61 = vsel %vm2062_vm6, %v529_v8, %v525_v39  ;;  %v535_v26 = vmul.f32 %v1269_v19, %v534_v12  ;;  %v581_v62 = vperm.slane %v560_v49, 0  ;;  %v607_v52 = vpack.c.bf16 %v575_v50, %v575_v50 }
  0xa3   :  { %v553_v35 = vmul.f32 255.0, %v530_v61  ;;  %v609_v54 = vpack.c.bf16 %v577_v51, %v577_v51  ;;  %v611_v55 = vpack.c.bf16 %v579_v58, %v579_v58  ;;  %v667_v1 = vunpack.c.l.b16 %v603_v59 }
  0xa4   :  { %v536_v21 = vadd.f32 %v1269_v19, %v535_v26  ;;  %v613_v41 = vpack.c.bf16 %v581_v62, %v581_v62  ;;  %v669_v0 = vunpack.c.l.b16 %v605_v60  ;;  %v671_v42 = vunpack.c.l.b16 %v607_v52 }
  0xa5   :  { %v561_v40 = vfloor.f32 %v553_v35  ;;  %v673_v43 = vunpack.c.l.b16 %v609_v54  ;;  %v675_v44 = vunpack.c.l.b16 %v611_v55  ;;  %vm684_vm0 = vcmask 1041409  }
  0xa6   :  { %v540_v24 = vsel %vm2125_vm15, %v1269_v19, %v536_v21  ;;  %v677_v7 = vunpack.c.l.b16 %v613_v41  ;;  %v683_v25 = vrot.slane %v669_v0, 7  ;;  %v686_v10 = vrot.slane %v671_v42, 6 }
  0xa7   :  { %v545_v3 = vsel %vm2094_vm12, %v544_v9, %v540_v24  ;;  %v583_v23 = vperm.slane %v561_v40, 0  ;;  %vm687_vm5 = vcmask 1042434   ;;  %v689_v15 = vrot.slane %v673_v43, 5 }
  0xa8   :  { %v554_v5 = vmul.f32 255.0, %v545_v3  ;;  %v685_v46 = vsel %vm684_vm0, %v683_v25, %v667_v1  ;;  %vm690_vm1 = vcmask 1043459   ;;  %v692_v6 = vrot.slane %v675_v44, 4 }
  0xa9   :  { %v615_v18 = vpack.c.bf16 %v583_v23, %v583_v23  ;;  %v688_v37 = vsel %vm687_vm5, %v686_v10, %v685_v46  ;;  %vm693_vm7 = vcmask 1044484   ;;  %v695_v56 = vrot.slane %v677_v7, 3 }
  0xaa   :  { %v562_v8 = vfloor.f32 %v554_v5  ;;  %v691_v11 = vsel %vm690_vm1, %v689_v15, %v688_v37  ;;  %vm696_vm2 = vcmask 1045509   ;;  %vm699_vm3 = vcmask 1046534  }
  0xab   :  { %v679_v48 = vunpack.c.l.b16 %v615_v18  ;;  %v694_v28 = vsel %vm693_vm7, %v692_v6, %v691_v11  ;;  %vm702_vm4 = vcmask 1047559   ;;  %v572_v4 = vperm.slane %v555_v31, 1 }
  0xac   :  { %v585_v13 = vperm.slane %v562_v8, 0  ;;  %v697_v47 = vsel %vm696_vm2, %v695_v56, %v694_v28  ;;  %v574_v29 = vperm.slane %v556_v32, 1  ;;  %v576_v30 = vperm.slane %v557_v27, 1 }
  0xad   :  { %v698_v9 = vrot.slane %v679_v48, 2  ;;  %v578_v14 = vperm.slane %v558_v33, 1  ;;  %v580_v19 = vperm.slane %v559_v36, 1  ;;  %v582_v20 = vperm.slane %v560_v49, 1 }
  0xae   :  { %v617_v22 = vpack.c.bf16 %v585_v13, %v585_v13  ;;  %v584_v16 = vperm.slane %v561_v40, 1  ;;  %v586_v63 = vperm.slane %v562_v8, 1  ;;  %v604_v38 = vpack.c.bf16 %v572_v4, %v572_v4 }
  0xaf   :  { %v700_v34 = vsel %vm699_vm3, %v698_v9, %v697_v47  ;;  %v606_v57 = vpack.c.bf16 %v574_v29, %v574_v29  ;;  %v608_v45 = vpack.c.bf16 %v576_v30, %v576_v30  ;;  %v610_v31 = vpack.c.bf16 %v578_v14, %v578_v14 }
  0xb0   :  { %v681_v17 = vunpack.c.l.b16 %v617_v22  ;;  %v612_v12 = vpack.c.bf16 %v580_v19, %v580_v19  ;;  %v614_v50 = vpack.c.bf16 %v582_v20, %v582_v20  ;;  %v616_v51 = vpack.c.bf16 %v584_v16, %v584_v16 }
  0xb1   :  { %v618_v2 = vpack.c.bf16 %v586_v63, %v586_v63  ;;  %v668_v32 = vunpack.c.l.b16 %v604_v38  ;;  %v670_v27 = vunpack.c.l.b16 %v606_v57  ;;  %v672_v39 = vunpack.c.l.b16 %v608_v45 }
  0xb2   :  { %v701_v33 = vrot.slane %v681_v17, 1  ;;  %v674_v36 = vunpack.c.l.b16 %v610_v31  ;;  %v676_v49 = vunpack.c.l.b16 %v612_v12  ;;  %v678_v58 = vunpack.c.l.b16 %v614_v50 }
  0xb3   :  { %v680_v59 = vunpack.c.l.b16 %v616_v51  ;;  %v682_v60 = vunpack.c.l.b16 %v618_v2  ;;  %v704_v61 = vrot.slane %v670_v27, 7  ;;  %v706_v26 = vrot.slane %v672_v39, 6 }
  0xb4   :  { %v703_v62 = vsel %vm702_vm4, %v701_v33, %v700_v34  ;;  %v708_v52 = vrot.slane %v674_v36, 5  ;;  %v710_v53 = vrot.slane %v676_v49, 4  ;;  %v712_v55 = vrot.slane %v678_v58, 3 }
  0xb5   :  { %v718_v35 = vpack.c.b16 %v703_v62, %v703_v62  ;;  %v705_v54 = vsel %vm684_vm0, %v704_v61, %v668_v32  ;;  %v714_v21 = vrot.slane %v680_v59, 2  ;;  %v716_v0 = vrot.slane %v682_v60, 1 }
  0xb6   :  { %v707_v1 = vsel %vm687_vm5, %v706_v26, %v705_v54 }
  0xb7   :  { %890 = vmatmul.bf16.vlgmr.msra.gmra.mxu0 %v718_v35  ;;  %v709_v41 = vsel %vm690_vm1, %v708_v52, %v707_v1  ;;  %916 = vmatmul.bf16.vlgmr.msra.gmra.mxu2 %v718_v35 }
  0xb8   :  { %v711_v42 = vsel %vm693_vm7, %v710_v53, %v709_v41 }
  0xb9   :  { %v713_v40 = vsel %vm696_vm2, %v712_v55, %v711_v42 }
  0xba   :  { %v715_v43 = vsel %vm699_vm3, %v714_v21, %v713_v40 }
  0xbb   :  { %v717_v44 = vsel %vm702_vm4, %v716_v0, %v715_v43 }
  0xbc   :  { %v719_v24 = vpack.c.b16 %v717_v44, %v717_v44 }
  0xbe   :  { %903 = vmatmul.bf16.vlgmr.msra.gmra.mxu1 %v719_v24  ;;  %929 = vmatmul.bf16.vlgmr.msra.gmra.mxu3 %v719_v24 }
 0x134   :  { %v891_v7 = vpop.f32.mrf.mxu0 }
 0x13a   :  { %v917_v25 = vpop.f32.mrf.mxu2 }
 0x13b   :  { %v904_v10 = vpop.f32.mrf.mxu1 }
 0x13c   :  { %v893_v3 = vpop.f32.mrf.mxu0  ;;  %v905_v23 = vadd.f32 %v904_v10, %v891_v7 }
 0x141   :  { %v930_v15 = vpop.f32.mrf.mxu3 }
 0x142   :  { %v931_v5 = vadd.f32 %v930_v15, %v917_v25  ;;  %v919_v46 = vpop.f32.mrf.mxu2 }
 0x143   :  { %v906_v6 = vpop.f32.mrf.mxu1 }
 0x144   :  { %v934_v18 = vmax.f32 %v905_v23, %v931_v5 }
 0x146   :  { %935 = vmax.xlane.f32.xlu0 %v934_v18 }
 0x149   :  { %v932_v37 = vpop.f32.mrf.mxu3 }
 0x1b9   :  { %v936_v56 = vpop.xlane.xlu0 %935 }
 0x1ba   :  { %v937_v8 = vmax.f32 %v936_v56, 1e-12 }
 0x1bc   :  { %1270 = vrcp.f32 %v937_v8  ;;  %v949_v4 = vand.u32 2147483648, %v937_v8  ;;  %v947_v47 = vand.u32 2147483647, %v937_v8  ;;  %vm943_vm8 = vweird.f32 %v937_v8 }
 0x1be   :  { %v950_v30 = vor.u32 1.1754944e-38, %v949_v4  ;;  %vm948_vm11 = vcmp.eq.f32.partialorder %v947_v47, 8.507059e+37 }
 0x1c2   :  { %v1271_v11 = vpop.eup %1270 }
 0x1c3   :  { %v939_v48 = vmul.f32 %v1271_v11, %v937_v8  ;;  %vm944_vm6 = vweird.f32 %v1271_v11 }
 0x1c4   :  { %vm945_vm9 = vmor %vm943_vm8, %vm944_vm6 }
 0x1c5   :  { %v940_v28 = vsub.f32 1.0, %v939_v48 }
 0x1c7   :  { %v941_v13 = vmul.f32 %v1271_v11, %v940_v28 }
 0x1c9   :  { %v942_v29 = vadd.f32 %v1271_v11, %v941_v13 }
 0x1cb   :  { %v946_v9 = vsel %vm945_vm9, %v1271_v11, %v942_v29 }
 0x1cc   :  { %v951_v14 = vsel %vm948_vm11, %v950_v30, %v946_v9 }
 0x1cd   :  { %v952_v19 = vmul.f32 %v951_v14, %v905_v23  ;;  %v953_v20 = vmul.f32 %v951_v14, %v931_v5 }
 0x1cf   :  { %v954_v22 = vmul.f32 255.0, %v952_v19  ;;  %v955_v16 = vmul.f32 255.0, %v953_v20 }
 0x1d1   :  { %956 = vst [vmem:[#allocation2] sm:$0xff] %v954_v22 }
 0x1d2   :  { %957 = vst [vmem:[#allocation2 + $0x8] sm:$0xff] %v955_v16 }
 0x1d3   :  { %968 = dma.vmem_to_hbm [thread:$0]  %s964_s14, 256, %s966_s17, [#allocation3]  }
 0x1d4   :  { %1296 = dma.done.wait [#allocation3], 256  }
 0x1d5   :  { %1297 = vsyncadd [#allocation3], 4294967040 }
 0x1d6   :  { %973 = vsyncpa [#allocation3], 1 }

</bundles_post_ra>
